<compile_context>
chip_gen: v7x
topology: tpu7x:2x2x1
jax: 0.10.0
libtpu: 0.0.40
codegen_flags: <defaults>
</compile_context>

<pallas_src>
import functools
import math

import jax
import jax.numpy as jnp
from jax.experimental import pallas as pl
from jax.experimental.pallas import tpu as pltpu

LANES = 128


def _reluk_kernel(x_ref, o_ref, *, channel_max):
    x = x_ref[...]
    zero = jnp.zeros((), dtype=x.dtype)
    # NOTE: for integer dtypes a fractional channel_max truncates (e.g. 6.5 -> 6).
    cap = jnp.asarray(channel_max, dtype=x.dtype)
    o_ref[...] = jnp.minimum(jnp.maximum(x, zero), cap)


def _sublane_unit(dtype) -> int:
    # Full-vreg sublane packing: 8 rows for 4-byte, 16 for 2-byte, 32 for 1-byte dtypes.
    return max(8, 32 // jnp.dtype(dtype).itemsize)


def _ceil_to(a: int, m: int) -> int:
    return ((a + m - 1) // m) * m


def _chip_tuning():
    """(target_block_bytes, is_v7x, vmem_limit_bytes_or_None) per TPU generation."""
    kind = ""
    try:
        kind = jax.devices()[0].device_kind.lower()
    except Exception:
        pass
    if "v7" in kind or "7x" in kind:
        # 2 TCs @ ~3.2 TB/s, 64 MiB VMEM/TC: 8 MiB blocks amortize the ~0.35 us
        # per-grid-step overhead to <10%; 2(in+out) x 2(buffers) x 8 MiB = 32 MiB
        # working set, so raise the scoped-VMEM limit (default 32 MiB).
        return 8 << 20, True, 48 << 20
    if "v6" in kind:
        # 4 MiB blocks -> 16 MiB double-buffered working set, well under the
        # 32 MiB default scoped VMEM (128 MiB physical).
        return 4 << 20, False, None
    # v5e and unknown chips: 2 MiB blocks keep the 8 MiB working set under the
    # 16 MiB default scoped VMEM; bigger blocks buy nothing at ~0.8 TB/s.
    return 2 << 20, False, None


def _choose_2d_view(shape, n, dtype, max_block_bytes):
    """Pick a (rows, cols) view of `shape` obtained by grouping contiguous
    leading/trailing dims (an order-preserving reshape -> no data movement).

    If numel is a multiple of 128 the fully lane-dense (n/128, 128) slab wins.
    Otherwise choose the split maximizing lane utilization (cols / lane-padded
    cols) times sublane utilization (rows vs. the dtype's sublane unit), so a
    ragged total is absorbed by hardware lane masking instead of extra HBM
    padding/slice/concat passes.  Returns None only for pathological shapes
    whose smallest legal block would not fit the VMEM block budget.
    """
    itemsize = jnp.dtype(dtype).itemsize
    row_unit = _sublane_unit(dtype)
    if n % LANES == 0:
        return n // LANES, LANES
    best, best_score = None, -1.0
    for k in range(len(shape) + 1):
        rows = math.prod(shape[:k])
        cols = math.prod(shape[k:])
        cols_padded = _ceil_to(cols, LANES)
        if cols_padded * row_unit * itemsize > max_block_bytes:
            continue  # even a single row-unit-tall block would blow the budget
        score = (cols / cols_padded) * (min(rows, row_unit) / row_unit)
        if score > best_score:
            best, best_score = (rows, cols), score
    return best


def reluk(x, channel_max=6.0):
    """y = clamp(x, 0, channel_max) elementwise via a Pallas TPU kernel.

    Works for any shape (e.g. NCHW); returns an array of the same shape/dtype.
    `channel_max` must be a static Python scalar (it is a module constructor
    constant); float() raises clearly if a traced value is passed.
    """
    orig_shape = x.shape
    dtype = x.dtype
    n = x.size
    if n == 0:
        return x
    cap = float(channel_max)

    itemsize = jnp.dtype(dtype).itemsize
    row_unit = _sublane_unit(dtype)
    target_block_bytes, is_v7x, vmem_limit = _chip_tuning()

    view = _choose_2d_view(orig_shape, n, dtype, target_block_bytes)
    if view is None:
        # Pathological ragged shape (a single un-tileable row wider than the
        # block budget).  A fused XLA clamp is already a single streaming HBM
        # pass, which beats padding the tensor just to reach the kernel.
        return jnp.clip(x, jnp.zeros((), dtype), jnp.asarray(cap, dtype))

    rows, cols = view
    slab = jnp.reshape(x, (rows, cols))  # contiguous regrouping of dims

    # Row-tile selection: target one block of ~target_block_bytes (VMEM
    # footprint counts lane padding when `cols` is not a multiple of 128),
    # rounded to the dtype's sublane unit.  A ragged last row block is masked
    # by Pallas; a single-step grid is fine on single-TC chips.
    row_bytes = _ceil_to(cols, LANES) * itemsize
    tr_target = max(row_unit, (target_block_bytes // row_bytes) // row_unit * row_unit)
    tr = tr_target if tr_target < rows else rows
    grid = pl.cdiv(rows, tr)

    # v7x only: split big tensors into an even number of near-equal row blocks
    # so the two TensorCores get balanced halves.
    if is_v7x and rows >= 2 * row_unit and n * itemsize >= (2 << 20):
        steps = max(2, 2 * ((grid + 1) // 2))
        tr = min(rows, max(row_unit, _ceil_to(pl.cdiv(rows, steps), row_unit)))
        grid = pl.cdiv(rows, tr)

    core_parallel = getattr(pltpu, "CORE_PARALLEL", None)
    if is_v7x and core_parallel is not None and grid >= 2 and grid % 2 == 0:
        dim_sem = (core_parallel,)  # shard row blocks across both v7x TCs
    else:
        dim_sem = ("parallel",)

    kernel = functools.partial(_reluk_kernel, channel_max=cap)

    out_slab = pl.pallas_call(
        kernel,
        out_shape=jax.ShapeDtypeStruct((rows, cols), dtype),
        grid_spec=pltpu.PrefetchScalarGridSpec(
            num_scalar_prefetch=0,
            grid=(grid,),
            in_specs=[pl.BlockSpec((tr, cols), lambda i: (i, 0))],
            out_specs=pl.BlockSpec((tr, cols), lambda i: (i, 0)),
        ),
        compiler_params=pltpu.CompilerParams(
            dimension_semantics=dim_sem,
            vmem_limit_bytes=vmem_limit),
        cost_estimate=pl.CostEstimate(
            flops=2 * n,
            transcendentals=0,
            bytes_accessed=2 * n * itemsize),
    )(slab)

    return jnp.reshape(out_slab, orig_shape)


if __name__ == "__main__":
    key = jax.random.PRNGKey(0)
    channel_max = 6.0

    # Primary test: small NCHW activation tensor (as used by the PyTorch module).
    x = jax.random.normal(key, (2, 4, 16, 16), dtype=jnp.float32) * 5.0
    y = jax.block_until_ready(reluk(x, channel_max))
    assert y.shape == x.shape and y.dtype == x.dtype
    assert jnp.allclose(y, jnp.clip(x, 0.0, channel_max)), "mismatch (f32 NCHW)"

    # Ragged total (numel % 128 != 0): handled in-kernel via a full-width
    # trailing block — no padding / slice / concatenate copies.
    x2 = jax.random.normal(jax.random.PRNGKey(1), (8, 1000), dtype=jnp.float32) * 5.0
    y2 = jax.block_until_ready(reluk(x2, channel_max))
    assert jnp.allclose(y2, jnp.clip(x2, 0.0, channel_max)), "mismatch (ragged 8x1000)"

    # Small, very ragged shape (exercises the 2-D view chooser).
    x3 = jax.random.normal(jax.random.PRNGKey(2), (2, 3, 5, 9), dtype=jnp.float32) * 5.0
    y3 = jax.block_until_ready(reluk(x3, channel_max))
    assert jnp.allclose(y3, jnp.clip(x3, 0.0, channel_max)), "mismatch (ragged small)"

    # bf16 path (16-row sublane unit).
    x4 = (jax.random.normal(jax.random.PRNGKey(3), (2, 4, 16, 16),
                            dtype=jnp.float32) * 5.0).astype(jnp.bfloat16)
    y4 = jax.block_until_ready(reluk(x4, channel_max))
    y4_ref = jnp.clip(x4, jnp.bfloat16(0.0), jnp.bfloat16(channel_max))
    assert y4.dtype == jnp.bfloat16 and jnp.array_equal(y4, y4_ref), "mismatch (bf16)"

    print("KERNEL_OK")
</pallas_src>

<mosaic_0001>
module attributes {stable_mosaic.version = 11 : i64} {
  func.func @_reluk_kernel(%arg0: i32, %arg1: memref<16x128xf32, #tpu.memory_space<vmem>>, %arg2: memref<16x128xf32, #tpu.memory_space<vmem>>) attributes {dimension_semantics = [#tpu.dimension_semantics<parallel>], iteration_bounds = array<i64: 1>, scalar_prefetch = 0 : i64, scratch_operands = 0 : i64, tpu.core_type = #tpu.core_type<tc>, window_params = [{transform_indices = @transform_0, window_bounds = array<i64: 16, 128>}, {transform_indices = @transform_1, window_bounds = array<i64: 16, 128>}]} {
    %c0 = arith.constant 0 : index
    %c0_0 = arith.constant 0 : index
    %0 = vector.load %arg1[%c0, %c0_0] : memref<16x128xf32, #tpu.memory_space<vmem>>, vector<16x128xf32>
    %cst = arith.constant 0.000000e+00 : f32
    %1 = vector.broadcast %cst : f32 to vector<16x128xf32>
    %2 = arith.maximumf %0, %1 : vector<16x128xf32>
    %cst_1 = arith.constant 6.000000e+00 : f32
    %3 = vector.broadcast %cst_1 : f32 to vector<16x128xf32>
    %4 = arith.minimumf %2, %3 : vector<16x128xf32>
    %c0_2 = arith.constant 0 : index
    %c0_3 = arith.constant 0 : index
    %5 = vector.load %arg2[%c0_2, %c0_3] : memref<16x128xf32, #tpu.memory_space<vmem>>, vector<16x128xf32>
    tpu.vector_store %arg2[%c0_2, %c0_3], %4 {strides = array<i32>} : memref<16x128xf32, #tpu.memory_space<vmem>>, vector<16x128xf32>,
    return
  }
  func.func @transform_0(%arg0: i32) -> (i32, i32) {
    %c0_i32 = arith.constant 0 : i32
    %c0_i32_0 = arith.constant 0 : i32
    return %arg0, %c0_i32 : i32, i32
  }
  func.func @transform_1(%arg0: i32) -> (i32, i32) {
    %c0_i32 = arith.constant 0 : i32
    %c0_i32_0 = arith.constant 0 : i32
    return %arg0, %c0_i32 : i32, i32
  }
}

</mosaic_0001>

<bundles_post_ra>
// kernel: tpu_custom_call.1
= control target key start
LH: loop header
LB: loop body
LE: loop exit
PB: predicated region body
PF: predicated region fallthrough
CT: control target
= control target key end

     0   :  { %6 = vsyncpa [#allocation3], 0  ;;  %s144_s0 = inlined_call_operand.hbm [shape: f32[16,128], index: 0, kind: input, shape index: {}]   ;;  %s145_s1 = inlined_call_operand.hbm [shape: f32[16,128], index: 1, kind: output, shape index: {}]  }
   0x1   :  { %7 = vsyncpa [#allocation4], 0  ;;  %s100_s6 = smov [#allocation2]   ;;  %s52_s10 = scalar_lea.hbm %s144_s0, 256 }
   0x2   :  { %s13_s7 = sshll.u32 %s100_s6, 4  ;;  %p53_p0 = scmp.ne.s32.totalorder %s144_s0, %s52_s10  ;;  %s14_s7 = int_to_ptr.vmem [resolvable:$true] %s13_s7 }
   0x3   :  { %p56_p1 = scmp.lt.u32.totalorder %s52_s10, %s144_s0 }
   0x5   :  { %p58_p2 = pnand %p56_p1, %p53_p0 }
   0x7   :  { %61 = shalt.err (!%p58_p2)
}
   0x8   :  { %s62_s15 = scalar_lea.vmem %s14_s7, 256  ;;  %p67_p4 = scmp.lt.s32.totalorder %s14_s7, %s14_s7 }
   0x9   :  { %p63_p3 = scmp.ne.s32.totalorder %s14_s7, %s62_s15  ;;  %p68_p5 = scmp.lt.s32.totalorder %s62_s15, %s62_s15 }
   0xb   :  { %p69_p6 = por %p68_p5, %p67_p4 }
   0xd   :  { %p70_p7 = pnand %p69_p6, %p63_p3 }
   0xf   :  { %73 = shalt.err (!%p70_p7)
}
  0x10   :  { %s101_s16 = smov 128   ;;  %s102_s17 = smov 8  }
  0x11   :  { %19 = dma.hbm_to_vmem [thread:$0]  %s144_s0, 256, %s14_s7, [#allocation3], %s101_s16, %s101_s16, %s102_s17  }
  0x12   :  { %96 = dma.done.wait [#allocation3], 256  }
  0x13   :  { %97 = vsyncadd [#allocation3], 4294967040  ;;  %v23_v0 = vld [vmem:[#allocation2] sm:$0xff]  ;;  %v24_v1 = vld [vmem:[#allocation2 + $0x8] sm:$0xff]  ;;  %s103_s20 = smov [#allocation5]  }
  0x14   :  { %s36_s21 = sshll.u32 %s103_s20, 4  ;;  %v25_v2 = vmax.f32 %v23_v0, 0.0  ;;  %v26_v3 = vmax.f32 %v24_v1, 0.0  ;;  %s37_s21 = int_to_ptr.vmem [resolvable:$true] %s36_s21 }
  0x15   :  { %s74_s22 = scalar_lea.vmem %s37_s21, 256  ;;  %p79_p9 = scmp.lt.s32.totalorder %s37_s21, %s37_s21 }
  0x16   :  { %v27_v4 = vmin.f32 %v25_v2, 6.0  ;;  %v28_v5 = vmin.f32 %v26_v3, 6.0  ;;  %p75_p8 = scmp.ne.s32.totalorder %s37_s21, %s74_s22  ;;  %p80_p10 = scmp.lt.s32.totalorder %s74_s22, %s74_s22 }
  0x18   :  { %29 = vst [vmem:[#allocation5] sm:$0xff] %v27_v4  ;;  %30 = vst [vmem:[#allocation5 + $0x8] sm:$0xff] %v28_v5  ;;  %p81_p11 = por %p80_p10, %p79_p9 }
  0x1a   :  { %p82_p12 = pnand %p81_p11, %p75_p8 }
  0x1c   :  { %85 = shalt.err (!%p82_p12)
}
  0x1d   :  { %s86_s24 = scalar_lea.hbm %s145_s1, 256 }
  0x1e   :  { %p87_p13 = scmp.ne.s32.totalorder %s145_s1, %s86_s24  ;;  %p90_p0 = scmp.lt.u32.totalorder %s86_s24, %s145_s1 }
  0x20   :  { %p92_p1 = pnand %p90_p0, %p87_p13 }
  0x22   :  { %95 = shalt.err (!%p92_p1)
}
  0x23   :  { %42 = dma.vmem_to_hbm [thread:$0]  %s37_s21, 256, %s145_s1, [#allocation4], %s101_s16, %s101_s16, %s102_s17  }
  0x24   :  { %98 = dma.done.wait [#allocation4], 256  }
  0x25   :  { %99 = vsyncadd [#allocation4], 4294967040 }
  0x26   :  { %46 = vsyncpa [#allocation3], 1 }
  0x27   :  { %47 = vsyncpa [#allocation4], 1 }

</bundles_post_ra>
